<compile_context>
chip_gen: v7x
topology: tpu7x:2x2x1
jax: 0.10.0
libtpu: 0.0.40
codegen_flags: <defaults>
</compile_context>

<pallas_src>
import math

import jax
import jax.numpy as jnp
from jax.experimental import pallas as pl
from jax.experimental.pallas import tpu as pltpu

_LANE = 128
_MAX_PACKED_LANE = 4096                 # cap on lcm-packed lane width
_TILE_BUDGET_BYTES = 8 * 1024 * 1024    # per tile buffer (input OR output)
_VMEM_LIMIT_CAP = 48 * 1024 * 1024      # safe on v5e/v6e (128 MiB) and v7x (64 MiB)
_MIN_PALLAS_BYTES = 1 * 1024 * 1024     # below this, plain jnp fuses better


def _metric_calc_kernel(h_ref, w_ref, o_ref):
    # h_ref: (tm, lane) row tile; w_ref: (1, lane) resident weight row.
    # Pure VPU broadcast multiply (elementwise hot path).
    o_ref[...] = h_ref[...] * w_ref[...]


def _sublane_for_itemsize(itemsize):
    # Sub-32-bit dtypes pack along sublanes: f32 -> 8, bf16 -> 16, int8/fp8 -> 32.
    return {4: 8, 2: 16, 1: 32}.get(itemsize, 8)


def _choose_layout(nhid):
    """Pick a lane width that is a multiple of 128 and whose per-row weight
    pattern is constant (lane % nhid == 0), so a single (1, lane) tiled weight
    broadcasts correctly over the repacked rows."""
    if nhid % _LANE == 0:
        return nhid, 1
    lane = math.lcm(nhid, _LANE)
    if lane <= _MAX_PACKED_LANE:
        return lane, lane // nhid
    # TODO(synk): nhid with a huge lcm(nhid, 128) keeps the sub-optimal
    # (masked-store) layout; correctness is unaffected.
    return nhid, 1


def metric_calc_layer(h: jax.Array, weight: jax.Array, *,
                      min_pallas_bytes: int = _MIN_PALLAS_BYTES,
                      tile_budget_bytes: int = _TILE_BUDGET_BYTES) -> jax.Array:
    """out = h * weight  (weight shape (1, nhid), broadcast over rows of h)."""
    N, nhid = h.shape
    assert weight.shape == (1, nhid)
    weight = weight.astype(h.dtype)
    itemsize = jnp.dtype(h.dtype).itemsize

    # Small-size fast path: launch overhead dominates and an opaque pallas_call
    # blocks XLA fusion with neighbouring ops.
    if N * nhid * itemsize < min_pallas_bytes:
        return h * weight

    lane, reps = _choose_layout(nhid)
    sublane = _sublane_for_itemsize(itemsize)

    # Pad rows only to a multiple of `reps` (needed for the lane repack).
    # For nhid % 128 == 0 (reps == 1) this is always a no-op.
    n_pad = -(-N // reps) * reps
    h_p = h if n_pad == N else jnp.pad(h, ((0, n_pad - N), (0, 0)))
    rows2 = n_pad // reps
    h2 = h_p.reshape(rows2, lane)                  # free (contiguous) reshape
    w2 = jnp.tile(weight, (1, reps)) if reps > 1 else weight

    # Largest sublane-multiple row tile under the per-buffer VMEM budget.
    tm_budget = max(sublane,
                    (tile_budget_bytes // (lane * itemsize)) // sublane * sublane)
    tm = min(tm_budget, rows2)                     # tm == rows2 -> full-dim block (valid)
    grid = (pl.cdiv(rows2, tm),)                   # partial last block is masked by Pallas

    # vmem_limit computed from the actual double-buffered footprint.
    tile_bytes = tm * lane * itemsize
    footprint = 4 * tile_bytes + 2 * lane * itemsize   # 2x in + 2x out + weight
    vmem_limit = int(min(_VMEM_LIMIT_CAP, max(16 << 20, footprint + (4 << 20))))

    out2 = pl.pallas_call(
        _metric_calc_kernel,
        out_shape=jax.ShapeDtypeStruct((rows2, lane), h.dtype),
        grid_spec=pltpu.PrefetchScalarGridSpec(
            num_scalar_prefetch=0,
            grid=grid,
            in_specs=[
                pl.BlockSpec((tm, lane), lambda i: (i, 0)),   # h row tile
                pl.BlockSpec((1, lane), lambda i: (0, 0)),    # weight row, resident
            ],
            out_specs=pl.BlockSpec((tm, lane), lambda i: (i, 0)),
        ),
        compiler_params=pltpu.CompilerParams(
            dimension_semantics=("parallel",),
            vmem_limit_bytes=vmem_limit,
        ),
    )(h2, w2)

    out = out2.reshape(n_pad, nhid)
    return out if n_pad == N else out[:N]


def xavier_uniform(key, shape, dtype=jnp.float32):
    # Matches torch.nn.init.xavier_uniform_ for a 2-D tensor (gain=1).
    fan_out, fan_in = shape  # torch: fan_in = size(1), fan_out = size(0)
    a = math.sqrt(3.0) * math.sqrt(2.0 / (fan_in + fan_out))
    return jax.random.uniform(key, shape, dtype=dtype, minval=-a, maxval=a)


if __name__ == "__main__":
    key = jax.random.PRNGKey(0)
    k_h, k_w = jax.random.split(key)

    nhid = 32   # mapped feature dimension
    N = 8       # number of nodes / rows of the Hadamard-product result

    h = jax.random.normal(k_h, (N, nhid), dtype=jnp.float32)
    weight = xavier_uniform(k_w, (1, nhid), dtype=jnp.float32)
    ref = h * weight

    # Fast (fused-jnp) path at the module's natural small size.
    out_fast = jax.block_until_ready(metric_calc_layer(h, weight))
    assert out_fast.shape == (N, nhid) and out_fast.dtype == h.dtype
    assert jnp.allclose(out_fast, ref, atol=1e-6, rtol=1e-6)

    # Force the Pallas path at the same small size (lane repack, single block).
    out = jax.block_until_ready(metric_calc_layer(h, weight, min_pallas_bytes=0))
    assert out.shape == (N, nhid) and out.dtype == h.dtype
    assert jnp.allclose(out, ref, atol=1e-6, rtol=1e-6)

    # Extra coverage, all forced through the Pallas path:
    #  - (10, 48): repack with row padding + tail slice (N % reps != 0)
    #  - (1000, 256): nhid % 128 == 0, no repack, single tile
    #  - (1000, 32) f32 with a tiny tile budget: multi-step grid, partial last block
    #  - (1000, 32) bf16: dtype-aware sublane (16) path
    cases = [
        (10, 48, jnp.float32, _TILE_BUDGET_BYTES),
        (1000, 256, jnp.float32, _TILE_BUDGET_BYTES),
        (1000, 32, jnp.float32, 64 * 128 * 4),
        (1000, 32, jnp.bfloat16, 64 * 128 * 4),
    ]
    for (n2, d2, dt, tile) in cases:
        kh2, kw2 = jax.random.split(jax.random.PRNGKey(n2 + d2))
        h2 = jax.random.normal(kh2, (n2, d2), dtype=dt)
        w2 = xavier_uniform(kw2, (1, d2), dtype=dt)
        o2 = jax.block_until_ready(
            metric_calc_layer(h2, w2, min_pallas_bytes=0, tile_budget_bytes=tile))
        tol = 1e-6 if dt == jnp.float32 else 2e-2
        assert o2.shape == (n2, d2) and o2.dtype == dt
        assert jnp.allclose(o2.astype(jnp.float32),
                            (h2 * w2).astype(jnp.float32), atol=tol, rtol=tol)

    print("KERNEL_OK")
</pallas_src>

<mosaic_0001>
module attributes {stable_mosaic.version = 11 : i64} {
  func.func @_metric_calc_kernel(%arg0: i32, %arg1: memref<2x128xf32, #tpu.memory_space<vmem>>, %arg2: memref<1x128xf32, #tpu.memory_space<vmem>>, %arg3: memref<2x128xf32, #tpu.memory_space<vmem>>) attributes {dimension_semantics = [#tpu.dimension_semantics<parallel>], iteration_bounds = array<i64: 1>, scalar_prefetch = 0 : i64, scratch_operands = 0 : i64, tpu.core_type = #tpu.core_type<tc>, window_params = [{transform_indices = @transform_0, window_bounds = array<i64: 2, 128>}, {pipeline_mode = #tpu.pipeline_mode<synchronous>, transform_indices = @transform_1, window_bounds = array<i64: 1, 128>}, {transform_indices = @transform_2, window_bounds = array<i64: 2, 128>}]} {
    %c0 = arith.constant 0 : index
    %c0_0 = arith.constant 0 : index
    %0 = vector.load %arg1[%c0, %c0_0] : memref<2x128xf32, #tpu.memory_space<vmem>>, vector<2x128xf32>
    %c0_1 = arith.constant 0 : index
    %c0_2 = arith.constant 0 : index
    %1 = vector.load %arg2[%c0_1, %c0_2] : memref<1x128xf32, #tpu.memory_space<vmem>>, vector<1x128xf32>
    %2 = vector.broadcast %1 : vector<1x128xf32> to vector<2x128xf32>
    %3 = arith.mulf %0, %2 : vector<2x128xf32>
    %c0_3 = arith.constant 0 : index
    %c0_4 = arith.constant 0 : index
    %4 = vector.load %arg3[%c0_3, %c0_4] : memref<2x128xf32, #tpu.memory_space<vmem>>, vector<2x128xf32>
    tpu.vector_store %arg3[%c0_3, %c0_4], %3 {strides = array<i32>} : memref<2x128xf32, #tpu.memory_space<vmem>>, vector<2x128xf32>,
    return
  }
  func.func @transform_0(%arg0: i32) -> (i32, i32) {
    %c0_i32 = arith.constant 0 : i32
    %c0_i32_0 = arith.constant 0 : i32
    return %arg0, %c0_i32 : i32, i32
  }
  func.func @transform_1(%arg0: i32) -> (i32, i32) {
    %c0_i32 = arith.constant 0 : i32
    %c0_i32_0 = arith.constant 0 : i32
    %c0_i32_1 = arith.constant 0 : i32
    return %c0_i32, %c0_i32_0 : i32, i32
  }
  func.func @transform_2(%arg0: i32) -> (i32, i32) {
    %c0_i32 = arith.constant 0 : i32
    %c0_i32_0 = arith.constant 0 : i32
    return %arg0, %c0_i32 : i32, i32
  }
}

</mosaic_0001>

<bundles_post_ra>
// kernel: tpu_custom_call.1
= control target key start
LH: loop header
LB: loop body
LE: loop exit
PB: predicated region body
PF: predicated region fallthrough
CT: control target
= control target key end

     0   :  { %7 = vsyncpa [#allocation3], 0  ;;  %s144_s0 = inlined_call_operand.hbm [shape: f32[2,128], index: 0, kind: input, shape index: {}]   ;;  %s145_s1 = inlined_call_operand.vmem [shape: f32[1,128], index: 1, kind: input, shape index: {}]   ;;  %s146_s2 = inlined_call_operand.hbm [shape: f32[2,128], index: 2, kind: output, shape index: {}]  }
   0x1   :  { %8 = vsyncpa [#allocation4], 0  ;;  %s100_s9 = smov [#allocation2]   ;;  %s52_s13 = scalar_lea.hbm %s144_s0, 32 }
   0x2   :  { %s15_s10 = sshll.u32 %s100_s9, 4  ;;  %p53_p0 = scmp.ne.s32.totalorder %s144_s0, %s52_s13  ;;  %s16_s10 = int_to_ptr.vmem [resolvable:$true] %s15_s10 }
   0x3   :  { %p56_p1 = scmp.lt.u32.totalorder %s52_s13, %s144_s0 }
   0x5   :  { %p58_p2 = pnand %p56_p1, %p53_p0 }
   0x7   :  { %61 = shalt.err (!%p58_p2)
}
   0x8   :  { %s62_s18 = scalar_lea.vmem %s16_s10, 32  ;;  %p67_p4 = scmp.lt.s32.totalorder %s16_s10, %s16_s10 }
   0x9   :  { %p63_p3 = scmp.ne.s32.totalorder %s16_s10, %s62_s18  ;;  %p68_p5 = scmp.lt.s32.totalorder %s62_s18, %s62_s18 }
   0xb   :  { %p69_p6 = por %p68_p5, %p67_p4 }
   0xd   :  { %p70_p7 = pnand %p69_p6, %p63_p3 }
   0xf   :  { %73 = shalt.err (!%p70_p7)
}
  0x10   :  { %18 = dma.hbm_to_vmem [thread:$0]  %s144_s0, 32, %s16_s10, [#allocation3]  }
  0x11   :  { %96 = dma.done.wait [#allocation3], 32  }
  0x12   :  { %97 = vsyncadd [#allocation3], 4294967264  ;;  %s101_s21 = smov [#allocation5]   ;;  %v24_v0 = vld [vmem:[#allocation2] sm:$0x3] }
  0x13   :  { %s40_s22 = sshll.u32 %s101_s21, 4  ;;  %v49_v1 = vld [vmem:[%s145_s1] ss:$0 sm:$0xff]  ;;  %s41_s22 = int_to_ptr.vmem [resolvable:$true] %s40_s22 }
  0x14   :  { %v32_v2 = vmul.f32 %v49_v1, %v24_v0  ;;  %s74_s25 = scalar_lea.vmem %s41_s22, 32  ;;  %p79_p9 = scmp.lt.s32.totalorder %s41_s22, %s41_s22 }
  0x15   :  { %p75_p8 = scmp.ne.s32.totalorder %s41_s22, %s74_s25  ;;  %p80_p10 = scmp.lt.s32.totalorder %s74_s25, %s74_s25 }
  0x16   :  { %33 = vst [vmem:[#allocation5] sm:$0x3] %v32_v2 }
  0x17   :  { %p81_p11 = por %p80_p10, %p79_p9 }
  0x19   :  { %p82_p12 = pnand %p81_p11, %p75_p8 }
  0x1b   :  { %85 = shalt.err (!%p82_p12)
}
  0x1c   :  { %s86_s27 = scalar_lea.hbm %s146_s2, 32 }
  0x1d   :  { %p87_p13 = scmp.ne.s32.totalorder %s146_s2, %s86_s27  ;;  %p90_p0 = scmp.lt.u32.totalorder %s86_s27, %s146_s2 }
  0x1f   :  { %p92_p1 = pnand %p90_p0, %p87_p13 }
  0x21   :  { %95 = shalt.err (!%p92_p1)
}
  0x22   :  { %43 = dma.vmem_to_hbm [thread:$0]  %s41_s22, 32, %s146_s2, [#allocation4]  }
  0x23   :  { %98 = dma.done.wait [#allocation4], 32  }
  0x24   :  { %99 = vsyncadd [#allocation4], 4294967264 }
  0x25   :  { %47 = vsyncpa [#allocation3], 1 }
  0x26   :  { %48 = vsyncpa [#allocation4], 1 }

</bundles_post_ra>
